<compile_context>
chip_gen: v7x
topology: tpu7x:2x2x1
jax: 0.10.0
libtpu: 0.0.40
codegen_flags: <defaults>
</compile_context>

<pallas_src>
import functools

import jax
import jax.numpy as jnp
from jax.experimental import pallas as pl
from jax.experimental.pallas import tpu as pltpu


# ----------------------------------------------------------------------------
# Kernels
# ----------------------------------------------------------------------------

def _alias_noop_kernel(x_ref, o_ref):
    # Output aliases input (input_output_aliases={0: 0}); refs live in pl.ANY
    # (HBM).  Nothing to do: no DMA is issued, no bytes are moved.
    pass


def _copy_kernel(x_ref, o_ref):
    # Lane-dense identity copy of one tile (only used by the copy variant).
    o_ref[...] = x_ref[...]


# ----------------------------------------------------------------------------
# Zero-movement path (primary)
# ----------------------------------------------------------------------------

def _alias_view(x2):
    """Pallas no-op whose output aliases the (already reshaped) input."""
    rows, feats = x2.shape
    return pl.pallas_call(
        _alias_noop_kernel,
        out_shape=jax.ShapeDtypeStruct((rows, feats), x2.dtype),
        in_specs=[pl.BlockSpec(memory_space=pl.ANY)],
        out_specs=pl.BlockSpec(memory_space=pl.ANY),
        input_output_aliases={0: 0},
    )(x2)


@functools.partial(jax.jit, static_argnames=("num_features",))
def adjust_size_down(x, num_features):
    """out = x.view(-1, num_features * 1 * 1): metadata reshape, no data moved."""
    total = x.size
    assert total % num_features == 0, "total elements must divide num_features"
    rows = total // num_features
    x2 = x.reshape(rows, num_features)  # metadata-only reshape, free
    return _alias_view(x2)


# ----------------------------------------------------------------------------
# Optional tuned copy variant (for callers that need a fresh buffer)
# ----------------------------------------------------------------------------

def _largest_lane_width(total, max_lanes=8192):
    """Largest multiple of 128 (<= max_lanes) L such that total % (8*L) == 0."""
    best = 0
    lane = 128
    while lane <= max_lanes:
        if total % (8 * lane) == 0:
            best = lane
        lane += 128
    return best  # 0 if no lane-dense factorization exists


def _pick_row_tile(copy_rows, row_bytes, max_tile_bytes=6 * 1024 * 1024):
    """Largest multiple-of-8 divisor of copy_rows with tile <= max_tile_bytes.

    copy_rows is a multiple of 8 by construction, so 8 always works.
    Tile <= 6 MiB keeps 2x(in) + 2x(out) double-buffered tiles ~24 MiB,
    safe on v7x's 64 MiB physical VMEM and on v5e/v6e.
    """
    t_max = min(copy_rows, max(8, max_tile_bytes // row_bytes))
    t = t_max - (t_max % 8)
    while t >= 8:
        if copy_rows % t == 0:
            return t
        t -= 8
    return 8


@functools.partial(jax.jit, static_argnames=("num_features",))
def adjust_size_down_copy(x, num_features):
    """Same semantics, but materializes a fresh output buffer via a tiled copy."""
    total = x.size
    assert total % num_features == 0, "total elements must divide num_features"
    rows = total // num_features
    dtype_bytes = jnp.dtype(x.dtype).itemsize

    lanes = _largest_lane_width(total)
    if lanes == 0:
        # Hardened fallback: no lane-dense factorization -> use the
        # zero-movement aliased view instead of masked / whole-array copies.
        return _alias_view(x.reshape(rows, num_features))

    copy_rows = total // lanes          # multiple of 8 by construction
    row_tile = _pick_row_tile(copy_rows, lanes * dtype_bytes)

    x2 = x.reshape(copy_rows, lanes)    # metadata-only reshape, free
    out2 = pl.pallas_call(
        _copy_kernel,
        out_shape=jax.ShapeDtypeStruct((copy_rows, lanes), x.dtype),
        grid=(copy_rows // row_tile,),
        in_specs=[pl.BlockSpec((row_tile, lanes), lambda i: (i, 0))],
        out_specs=pl.BlockSpec((row_tile, lanes), lambda i: (i, 0)),
        compiler_params=pltpu.CompilerParams(
            # Independent tiles; portable across v5e/v6e/v7x.
            # TODO(synk): on v7x, pltpu.CORE_PARALLEL would shard the copy
            # across both TensorCores (~2x copy bandwidth).
            dimension_semantics=("parallel",),
            # Explicit limit: lifts v5e's 16 MiB scoped default, stays within
            # v7x's 64 MiB physical VMEM.
            vmem_limit_bytes=48 * 1024 * 1024,
        ),
    )(x2)
    return out2.reshape(rows, num_features)


def adjust_size_down_ref(x, num_features):
    """Pure-JAX reference matching the PyTorch module."""
    return x.reshape(-1, num_features)


# ----------------------------------------------------------------------------
# Self-test
# ----------------------------------------------------------------------------

if __name__ == "__main__":
    key = jax.random.PRNGKey(0)
    k1, k2, k3 = jax.random.split(key, 3)

    # Typical use: a (B, C, 1, 1) pooled feature map flattened to (B, C).
    batch, num_features = 2, 32
    x = jax.random.normal(k1, (batch, num_features, 1, 1), dtype=jnp.float32)
    out = jax.block_until_ready(adjust_size_down(x, num_features))
    ref = adjust_size_down_ref(x, num_features)
    assert out.shape == (batch, num_features)
    assert jnp.array_equal(out, ref)

    # Copy variant, lane-dense path (total elements divisible by 8*128).
    b2, nf2 = 8, 128
    x2 = jax.random.normal(k2, (b2, nf2, 1, 1), dtype=jnp.float32)
    out2 = jax.block_until_ready(adjust_size_down_copy(x2, nf2))
    assert out2.shape == (b2, nf2)
    assert jnp.array_equal(out2, adjust_size_down_ref(x2, nf2))

    # Copy variant, awkward size -> hardened fallback (aliased no-op path).
    b3, nf3 = 3, 24
    x3 = jax.random.normal(k3, (b3, nf3, 1, 1), dtype=jnp.float32)
    out3 = jax.block_until_ready(adjust_size_down_copy(x3, nf3))
    assert out3.shape == (b3, nf3)
    assert jnp.array_equal(out3, adjust_size_down_ref(x3, nf3))

    print("KERNEL_OK")
</pallas_src>

<mosaic_0001>
module attributes {stable_mosaic.version = 11 : i64} {
  func.func @_alias_noop_kernel(%arg0: memref<2x32xf32, #tpu.memory_space<any>>, %arg1: memref<2x32xf32, #tpu.memory_space<any>>) attributes {dimension_semantics = [], scalar_prefetch = 0 : i64, scratch_operands = 0 : i64, tpu.core_type = #tpu.core_type<tc>} {
    return
  }
}

</mosaic_0001>

<bundles_post_ra>
// kernel: adjust_size_down.1
= control target key start
LH: loop header
LB: loop body
LE: loop exit
PB: predicated region body
PF: predicated region fallthrough
CT: control target
= control target key end

     0   :  { %s16_s0 = inlined_call_operand.hbm [shape: f32[2,32], index: 0, kind: input, shape index: {}, may-alias: {0,1}]   ;;  %s17_s1 = inlined_call_operand.hbm [shape: f32[2,32], index: 1, kind: output, shape index: {}, may-alias: {0,1}]  }

</bundles_post_ra>
